<compile_context>
chip_gen: v6e
topology: v6e:2x2x1
jax: 0.10.0
libtpu: 0.0.40
codegen_flags: <defaults>
</compile_context>

<pallas_src>
import functools

import jax
import jax.numpy as jnp
from jax.experimental import pallas as pl
from jax.experimental.pallas import tpu as pltpu

LANE = 128
SUBLANE = 8
MAX_BATCH_TILE = 2048                   # rows per grid step
VMEM_TILE_BUDGET = 12 * 1024 * 1024     # conservative vs. v5e's 16 MiB default scoped VMEM
MIN_DIM_FOR_BF16_MXU = 128              # bf16 MXU inputs once the layer is wide enough


def _round_up(x, m):
    return ((x + m - 1) // m) * m


def _round_down(x, m):
    return (x // m) * m


def actor_kernel(state_ref, w1_ref, b1_ref, w2_ref, b2_ref, out_ref):
    # Cast on the VPU (free slot); the DMA brought state in the caller's dtype.
    x = state_ref[...].astype(w1_ref.dtype)
    # First linear + ReLU: MXU matmul with f32 accumulation, f32 elementwise
    # (v5e's VPU/EUP have no bf16 arithmetic, so bias/ReLU/tanh stay f32).
    h = jnp.dot(x, w1_ref[...], preferred_element_type=jnp.float32)
    h = jnp.maximum(h + b1_ref[...], 0.0)                    # (tb, nneuro_p), f32
    # Second linear + tanh; output slab is lane-dense (num_action zero-padded to 128).
    a = jnp.dot(h.astype(w2_ref.dtype), w2_ref[...], preferred_element_type=jnp.float32)
    out_ref[...] = jnp.tanh(a + b2_ref[...]).astype(out_ref.dtype)


def prepare_actor_params(w1, b1, w2, b2):
    """One-time parameter prep (transpose / cast / zero-pad), hoisted off the forward path.

    w1: (num_neuro, num_state), b1: (num_neuro,)
    w2: (num_action, num_neuro), b2: (num_action,)
    """
    num_neuro, num_state = w1.shape
    num_action = w2.shape[0]
    nneuro_p = _round_up(num_neuro, LANE)     # lane-dense hidden width
    nout_p = _round_up(num_action, LANE)      # lane-dense output width (unmasked vst)

    # bf16 MXU inputs only when the layer is wide enough to matter; accumulation stays f32.
    mxu_dtype = (jnp.bfloat16
                 if min(num_state, num_neuro) >= MIN_DIM_FOR_BF16_MXU
                 else jnp.float32)

    w1_t = jnp.zeros((num_state, nneuro_p), jnp.float32)
    w1_t = w1_t.at[:, :num_neuro].set(jnp.asarray(w1, jnp.float32).T).astype(mxu_dtype)
    # Zero-padded b1 -> padded hidden units stay at relu(0 + 0) = 0.
    b1_p = jnp.zeros((1, nneuro_p), jnp.float32).at[:, :num_neuro].set(
        jnp.asarray(b1, jnp.float32))
    # Zero-padded W2 rows -> padded hidden units contribute nothing; zero-padded action
    # lanes give tanh(0) = 0 and are sliced off in the wrapper.
    w2_tp = jnp.zeros((nneuro_p, nout_p), jnp.float32)
    w2_tp = w2_tp.at[:num_neuro, :num_action].set(
        jnp.asarray(w2, jnp.float32).T).astype(mxu_dtype)
    b2_p = jnp.zeros((1, nout_p), jnp.float32).at[:, :num_action].set(
        jnp.asarray(b2, jnp.float32))

    # NOTE: num_state is deliberately NOT padded -- that would require a per-call pad of
    # `state` in HBM; a non-8-multiple feature dim is fine since the block covers the
    # full dim.
    return {"w1_t": w1_t, "b1": b1_p, "w2_tp": w2_tp, "b2_p": b2_p,
            "num_action": num_action}


def _choose_batch_tile(batch, bytes_per_row):
    """Big tiles (grid-step overhead amortised), but >= 2 grid steps once B >= 16 so the
    'parallel' batch axis shards across v7x's two TensorCores; capped by a conservative
    VMEM budget (the v5e 16 MiB default scoped VMEM, not v7x's physical size)."""
    if batch < 2 * SUBLANE:
        tb = _round_up(batch, SUBLANE)
    else:
        tb = min(MAX_BATCH_TILE, _round_up((batch + 1) // 2, SUBLANE))
    budget_rows = max(SUBLANE, _round_down(VMEM_TILE_BUDGET // bytes_per_row, SUBLANE))
    return min(tb, budget_rows)


@functools.partial(jax.jit, static_argnames=("num_action", "out_dtype"))
def _actor_forward_impl(state, w1_t, b1_p, w2_tp, b2_p, *, num_action, out_dtype):
    B, num_state = state.shape
    nneuro_p = w1_t.shape[1]
    nout_p = w2_tp.shape[1]
    out_itemsize = jnp.dtype(out_dtype).itemsize

    # Per-row VMEM cost: double-buffered state + output tiles plus the f32 hidden acts.
    bytes_per_row = (2 * (num_state * state.dtype.itemsize + nout_p * out_itemsize)
                     + nneuro_p * 4)
    tb = _choose_batch_tile(B, bytes_per_row)
    num_tiles = pl.cdiv(B, tb)   # ragged last tile is padded/masked by Mosaic; no jnp.pad

    weight_bytes = (w1_t.size * w1_t.dtype.itemsize + w2_tp.size * w2_tp.dtype.itemsize
                    + b1_p.size * b1_p.dtype.itemsize + b2_p.size * b2_p.dtype.itemsize)
    cost = pl.CostEstimate(
        flops=2 * B * nneuro_p * (num_state + nout_p) + 3 * B * nneuro_p + 2 * B * nout_p,
        transcendentals=B * nout_p,
        bytes_accessed=(B * num_state * state.dtype.itemsize
                        + B * nout_p * out_itemsize + weight_bytes))

    out = pl.pallas_call(
        actor_kernel,
        out_shape=jax.ShapeDtypeStruct((B, nout_p), out_dtype),
        grid=(num_tiles,),
        in_specs=[
            pl.BlockSpec((tb, num_state), lambda i: (i, 0)),          # state tile
            pl.BlockSpec((num_state, nneuro_p), lambda i: (0, 0)),    # W1^T, VMEM-resident
            pl.BlockSpec((1, nneuro_p), lambda i: (0, 0)),            # b1, resident
            pl.BlockSpec((nneuro_p, nout_p), lambda i: (0, 0)),       # W2^T, resident
            pl.BlockSpec((1, nout_p), lambda i: (0, 0)),              # b2, resident
        ],
        out_specs=pl.BlockSpec((tb, nout_p), lambda i: (i, 0)),
        compiler_params=pltpu.CompilerParams(dimension_semantics=("parallel",)),
        cost_estimate=cost,
    )(state, w1_t, b1_p, w2_tp, b2_p)

    # TODO(synk): at large B the remaining writeback win is packing 32 rows x 4 actions
    # into one 128-lane output row (needs an in-kernel (tb,4)->(tb/32,128) relayout);
    # deferred until that Mosaic reshape path is validated.  bf16 out_dtype already
    # halves the padded writeback.
    return out[:, :num_action]   # drop the zero-padded action lanes (tanh(0)=0 there)


def actor_forward(state, params, out_dtype=jnp.float32):
    """state: (B, num_state) -> action: (B, num_action) in [-1, 1].

    out_dtype=jnp.bfloat16 halves the lane-padded HBM writeback (tanh output is in
    [-1, 1]); the float32 default matches the PyTorch module exactly.
    NOTE: at tiny B (<~64) a plain fused XLA forward is competitive with a standalone
    pallas_call dispatch -- keep this call inside the caller's jit region.
    """
    return _actor_forward_impl(
        state, params["w1_t"], params["b1"], params["w2_tp"], params["b2_p"],
        num_action=params["num_action"], out_dtype=out_dtype)


if __name__ == "__main__":
    # Small shapes consistent with the module's forward.
    num_state, num_neuro, num_action = 16, 32, 4

    key = jax.random.PRNGKey(0)
    k_w1, k_w2, k_s1, k_s2 = jax.random.split(key, 4)

    # Deterministic init mirroring nn.init.normal_(w, 0.0, 0.1), constant bias 0.1.
    w1 = 0.1 * jax.random.normal(k_w1, (num_neuro, num_state), dtype=jnp.float32)
    b1 = jnp.full((num_neuro,), 0.1, dtype=jnp.float32)
    w2 = 0.1 * jax.random.normal(k_w2, (num_action, num_neuro), dtype=jnp.float32)
    b2 = jnp.full((num_action,), 0.1, dtype=jnp.float32)

    params = prepare_actor_params(w1, b1, w2, b2)

    def ref_fwd(s):
        return jnp.tanh(jnp.maximum(s @ w1.T + b1, 0.0) @ w2.T + b2)

    # Case 1: tiny batch, single tile, f32 output (default; matches the module).
    s8 = jax.random.normal(k_s1, (8, num_state), dtype=jnp.float32)
    a8 = jax.block_until_ready(actor_forward(s8, params))
    assert a8.shape == (8, num_action)
    assert jnp.allclose(a8, ref_fwd(s8), atol=1e-5, rtol=1e-5)

    # Case 2: batch that forces >= 2 grid steps with a ragged (masked) last tile.
    s20 = jax.random.normal(k_s2, (20, num_state), dtype=jnp.float32)
    a20 = jax.block_until_ready(actor_forward(s20, params))
    assert a20.shape == (20, num_action)
    assert jnp.allclose(a20, ref_fwd(s20), atol=1e-5, rtol=1e-5)

    # Case 3: bf16 output fast path (halved HBM writeback of the lane-padded slab).
    a8_bf16 = jax.block_until_ready(actor_forward(s8, params, out_dtype=jnp.bfloat16))
    assert a8_bf16.dtype == jnp.bfloat16
    assert jnp.allclose(a8_bf16.astype(jnp.float32), ref_fwd(s8), atol=2e-2, rtol=2e-2)

    print("KERNEL_OK")
</pallas_src>

<mosaic_0001>
module attributes {stable_mosaic.version = 11 : i64} {
  func.func @actor_kernel(%arg0: i32, %arg1: memref<8x16xf32, #tpu.memory_space<vmem>>, %arg2: memref<16x128xf32, #tpu.memory_space<vmem>>, %arg3: memref<1x128xf32, #tpu.memory_space<vmem>>, %arg4: memref<128x128xf32, #tpu.memory_space<vmem>>, %arg5: memref<1x128xf32, #tpu.memory_space<vmem>>, %arg6: memref<8x128xf32, #tpu.memory_space<vmem>>) attributes {dimension_semantics = [#tpu.dimension_semantics<parallel>], iteration_bounds = array<i64: 1>, scalar_prefetch = 0 : i64, scratch_operands = 0 : i64, tpu.core_type = #tpu.core_type<tc>, window_params = [{transform_indices = @transform_0, window_bounds = array<i64: 8, 16>}, {pipeline_mode = #tpu.pipeline_mode<synchronous>, transform_indices = @transform_1, window_bounds = array<i64: 16, 128>}, {pipeline_mode = #tpu.pipeline_mode<synchronous>, transform_indices = @transform_2, window_bounds = array<i64: 1, 128>}, {pipeline_mode = #tpu.pipeline_mode<synchronous>, transform_indices = @transform_3, window_bounds = array<i64: 128, 128>}, {pipeline_mode = #tpu.pipeline_mode<synchronous>, transform_indices = @transform_4, window_bounds = array<i64: 1, 128>}, {transform_indices = @transform_5, window_bounds = array<i64: 8, 128>}]} {
    %c0 = arith.constant 0 : index
    %c0_0 = arith.constant 0 : index
    %0 = vector.load %arg1[%c0, %c0_0] : memref<8x16xf32, #tpu.memory_space<vmem>>, vector<8x16xf32>
    %c0_1 = arith.constant 0 : index
    %c0_2 = arith.constant 0 : index
    %1 = vector.load %arg2[%c0_1, %c0_2] : memref<16x128xf32, #tpu.memory_space<vmem>>, vector<16x128xf32>
    %cst = arith.constant dense<0.000000e+00> : vector<8x128xf32>
    %2 = tpu.matmul %0, %1, %cst {dimension_numbers = #tpu.dot_dimension_numbers<[1], [0], [0], [1], [0, 0, 1, 1], [], []>} : vector<8x16xf32>, vector<16x128xf32>, vector<8x128xf32> -> vector<8x128xf32>
    %c0_3 = arith.constant 0 : index
    %c0_4 = arith.constant 0 : index
    %3 = vector.load %arg3[%c0_3, %c0_4] : memref<1x128xf32, #tpu.memory_space<vmem>>, vector<1x128xf32>
    %4 = vector.broadcast %3 : vector<1x128xf32> to vector<8x128xf32>
    %5 = arith.addf %2, %4 : vector<8x128xf32>
    %cst_5 = arith.constant 0.000000e+00 : f32
    %6 = vector.broadcast %cst_5 : f32 to vector<8x128xf32>
    %7 = arith.maximumf %5, %6 : vector<8x128xf32>
    %c0_6 = arith.constant 0 : index
    %c0_7 = arith.constant 0 : index
    %8 = vector.load %arg4[%c0_6, %c0_7] : memref<128x128xf32, #tpu.memory_space<vmem>>, vector<128x128xf32>
    %cst_8 = arith.constant dense<0.000000e+00> : vector<8x128xf32>
    %9 = tpu.matmul %7, %8, %cst_8 {dimension_numbers = #tpu.dot_dimension_numbers<[1], [0], [0], [1], [0, 0, 1, 1], [], []>} : vector<8x128xf32>, vector<128x128xf32>, vector<8x128xf32> -> vector<8x128xf32>
    %c0_9 = arith.constant 0 : index
    %c0_10 = arith.constant 0 : index
    %10 = vector.load %arg5[%c0_9, %c0_10] : memref<1x128xf32, #tpu.memory_space<vmem>>, vector<1x128xf32>
    %11 = vector.broadcast %10 : vector<1x128xf32> to vector<8x128xf32>
    %12 = arith.addf %9, %11 : vector<8x128xf32>
    %13 = math.tanh %12 : vector<8x128xf32>
    %c0_11 = arith.constant 0 : index
    %c0_12 = arith.constant 0 : index
    %14 = vector.load %arg6[%c0_11, %c0_12] : memref<8x128xf32, #tpu.memory_space<vmem>>, vector<8x128xf32>
    tpu.vector_store %arg6[%c0_11, %c0_12], %13 {strides = array<i32>} : memref<8x128xf32, #tpu.memory_space<vmem>>, vector<8x128xf32>,
    return
  }
  func.func @transform_0(%arg0: i32) -> (i32, i32) {
    %c0_i32 = arith.constant 0 : i32
    %c0_i32_0 = arith.constant 0 : i32
    return %arg0, %c0_i32 : i32, i32
  }
  func.func @transform_1(%arg0: i32) -> (i32, i32) {
    %c0_i32 = arith.constant 0 : i32
    %c0_i32_0 = arith.constant 0 : i32
    %c0_i32_1 = arith.constant 0 : i32
    return %c0_i32, %c0_i32_0 : i32, i32
  }
  func.func @transform_2(%arg0: i32) -> (i32, i32) {
    %c0_i32 = arith.constant 0 : i32
    %c0_i32_0 = arith.constant 0 : i32
    %c0_i32_1 = arith.constant 0 : i32
    return %c0_i32, %c0_i32_0 : i32, i32
  }
  func.func @transform_3(%arg0: i32) -> (i32, i32) {
    %c0_i32 = arith.constant 0 : i32
    %c0_i32_0 = arith.constant 0 : i32
    %c0_i32_1 = arith.constant 0 : i32
    return %c0_i32, %c0_i32_0 : i32, i32
  }
  func.func @transform_4(%arg0: i32) -> (i32, i32) {
    %c0_i32 = arith.constant 0 : i32
    %c0_i32_0 = arith.constant 0 : i32
    %c0_i32_1 = arith.constant 0 : i32
    return %c0_i32, %c0_i32_0 : i32, i32
  }
  func.func @transform_5(%arg0: i32) -> (i32, i32) {
    %c0_i32 = arith.constant 0 : i32
    %c0_i32_0 = arith.constant 0 : i32
    return %arg0, %c0_i32 : i32, i32
  }
}

</mosaic_0001>

<bundles_post_ra>
// kernel: _actor_forward_impl.1
= control target key start
LH: loop header
LB: loop body
LE: loop exit
PB: predicated region body
PF: predicated region fallthrough
CT: control target
= control target key end

     0   :  { %10 = vsyncpa [#allocation3], 0  ;;  %s438_s0 = inlined_call_operand.hbm [shape: f32[8,16], index: 0, kind: input, shape index: {}]   ;;  %s439_s1 = inlined_call_operand.hbm [shape: f32[16,128], index: 1, kind: input, shape index: {}]   ;;  %s440_s2 = inlined_call_operand.vmem [shape: f32[1,128], index: 2, kind: input, shape index: {}]   ;;  %s441_s3 = inlined_call_operand.hbm [shape: f32[128,128], index: 3, kind: input, shape index: {}]   ;;  %s442_s4 = inlined_call_operand.vmem [shape: f32[1,128], index: 4, kind: input, shape index: {}]   ;;  %s443_s5 = inlined_call_operand.vmem [shape: f32[8,128], index: 5, kind: output, shape index: {}]  }
   0x1   :  { %11 = vsyncpa [#allocation5], 0  ;;  %s383_s18 = smov [#allocation4]  }
   0x2   :  { %s27_s19 = sshll.u32 %s383_s18, 4  ;;  %s28_s19 = int_to_ptr.vmem [resolvable:$true] %s27_s19 }
   0x3   :  { %s327_s20 = scalar_lea.vmem %s28_s19, 256  ;;  %p332_p1 = scmp.lt.s32.totalorder %s28_s19, %s28_s19 }
   0x4   :  { %p328_p0 = scmp.ne.s32.totalorder %s28_s19, %s327_s20  ;;  %p333_p2 = scmp.lt.s32.totalorder %s327_s20, %s327_s20 }
   0x6   :  { %p334_p3 = por %p333_p2, %p332_p1 }
   0x8   :  { %p335_p4 = pnand %p334_p3, %p328_p0 }
   0xa   :  { %338 = shalt.err (!%p335_p4)
}
   0xb   :  { %s384_s21 = smov 128   ;;  %s385_s22 = smov 8  }
   0xc   :  { %33 = dma.hbm_to_vmem [thread:$0]  %s439_s1, 256, %s28_s19, [#allocation5], %s384_s21, %s384_s21, %s385_s22  }
   0xd   :  { %s386_s25 = smov [#allocation2]   ;;  %s387_s27 = smov [#allocation6]  }
   0xe   :  { %s18_s26 = sshll.u32 %s386_s25, 4  ;;  %s41_s28 = sshll.u32 %s387_s27, 4  ;;  %s19_s26 = int_to_ptr.vmem [resolvable:$true] %s18_s26  ;;  %s42_s28 = int_to_ptr.vmem [resolvable:$true] %s41_s28 }
   0xf   :  { %s347_s29 = scalar_lea.vmem %s19_s26, 128  ;;  %p352_p6 = scmp.lt.s32.totalorder %s19_s26, %s19_s26 }
  0x10   :  { %p348_p5 = scmp.ne.s32.totalorder %s19_s26, %s347_s29  ;;  %p353_p7 = scmp.lt.s32.totalorder %s347_s29, %s347_s29 }
  0x12   :  { %p354_p8 = por %p353_p7, %p352_p6 }
  0x14   :  { %p355_p9 = pnand %p354_p8, %p348_p5 }
  0x16   :  { %358 = shalt.err (!%p355_p9)
}
  0x17   :  { %21 = dma.hbm_to_vmem [thread:$0]  %s438_s0, 128, %s19_s26, [#allocation3]  }
  0x18   :  { %s367_s7 = scalar_lea.vmem %s42_s28, 2048  ;;  %p372_p11 = scmp.lt.s32.totalorder %s42_s28, %s42_s28 }
  0x19   :  { %p368_p10 = scmp.ne.s32.totalorder %s42_s28, %s367_s7  ;;  %p373_p12 = scmp.lt.s32.totalorder %s367_s7, %s367_s7 }
  0x1b   :  { %p374_p13 = por %p373_p12, %p372_p11 }
  0x1d   :  { %p375_p0 = pnand %p374_p13, %p368_p10 }
  0x1f   :  { %378 = shalt.err (!%p375_p0)
}
  0x20   :  { %47 = dma.hbm_to_vmem [thread:$0]  %s441_s3, 2048, %s42_s28, [#allocation5], %s384_s21, %s384_s21, %s385_s22  }
  0x21   :  { %379 = dma.done.wait [#allocation3], 128  }
  0x22   :  { %380 = vsyncadd [#allocation3], 4294967168 }
  0x23   :  { %381 = dma.done.wait [#allocation5], 2304  }
  0x24   :  { %382 = vsyncadd [#allocation5], 4294964992  ;;  %v388_v0 = vmov 0.0   ;;  %vm389_vm0 = vmmov 0   ;;  %v61_v1 = vld [vmem:[#allocation4 + $0x8] sm:$0xff]  ;;  %v60_v2 = vld [vmem:[#allocation4] sm:$0xff] }
  0x25   :  { %268 = vmatprep.subr.mxu0 %v388_v0  ;;  %272 = vmatprep.mubr.msk.f32.mxu0 %vm389_vm0, %v388_v0  ;;  %v59_v3 = vld [vmem:[#allocation2] sm:$0xff]  ;;  %vm69_vm1 = vcmask 130048   ;;  %v159_v4 = vld [vmem:[#allocation6 + $0x78] sm:$0xff]  ;;  %v158_v5 = vld [vmem:[#allocation6 + $0x70] sm:$0xff] }
  0x26   :  { %275 = vmatprep.subr.mxu1 %v388_v0  ;;  %307 = vmatprep.mubr.msk.f32.mxu1 %vm389_vm0, %v388_v0  ;;  %v157_v6 = vld [vmem:[#allocation6 + $0x68] sm:$0xff]  ;;  %v156_v7 = vld [vmem:[#allocation6 + $0x60] sm:$0xff]  ;;  %v155_v8 = vld [vmem:[#allocation6 + $0x58] sm:$0xff] }
  0x27   :  { %269 = vmatpush3.msra.mxu0 %v61_v1  ;;  %276 = vmatpush3.msra.mxu1 %v159_v4  ;;  %v154_v9 = vld [vmem:[#allocation6 + $0x50] sm:$0xff]  ;;  %v153_v10 = vld [vmem:[#allocation6 + $0x48] sm:$0xff]  ;;  %v152_v11 = vld [vmem:[#allocation6 + $0x40] sm:$0xff] }
  0x28   :  { %270 = vmatprep.subr.mxu0 %v388_v0  ;;  %277 = vmatprep.subr.mxu1 %v388_v0  ;;  %v151_v12 = vld [vmem:[#allocation6 + $0x38] sm:$0xff]  ;;  %v150_v13 = vld [vmem:[#allocation6 + $0x30] sm:$0xff]  ;;  %v149_v14 = vld [vmem:[#allocation6 + $0x28] sm:$0xff] }
  0x29   :  { %271 = vmatpush3.msra.mxu0 %v60_v2  ;;  %278 = vmatpush3.msra.mxu1 %v158_v5  ;;  %v148_v15 = vld [vmem:[#allocation6 + $0x20] sm:$0xff]  ;;  %v147_v16 = vld [vmem:[#allocation6 + $0x18] sm:$0xff]  ;;  %v146_v17 = vld [vmem:[#allocation6 + $0x10] sm:$0xff] }
  0x2a   :  { %273 = vmatmul.mubr.msk.f32.vlgmr.msra.gmra.mxu0 %vm69_vm1, %v59_v3  ;;  %279 = vmatprep.subr.mxu1 %v388_v0  ;;  %v145_v18 = vld [vmem:[#allocation6 + $0x8] sm:$0xff]  ;;  %v144_v19 = vld [vmem:[#allocation6] sm:$0xff] }
  0x2b   :  { %280 = vmatpush3.msra.mxu1 %v157_v6  ;;  %v245_v20 = vld [vmem:[%s440_s2] ss:$0 sm:$0xff] }
  0x2c   :  { %281 = vmatprep.subr.mxu1 %v388_v0  ;;  %v247_v25 = vld [vmem:[%s442_s4] ss:$0 sm:$0xff] }
  0x2d   :  { %282 = vmatpush3.msra.mxu1 %v156_v7 }
  0x2e   :  { %283 = vmatprep.subr.mxu1 %v388_v0 }
  0x2f   :  { %284 = vmatpush3.msra.mxu1 %v155_v8 }
  0x30   :  { %285 = vmatprep.subr.mxu1 %v388_v0 }
  0x31   :  { %286 = vmatpush3.msra.mxu1 %v154_v9 }
  0x32   :  { %287 = vmatprep.subr.mxu1 %v388_v0 }
  0x33   :  { %288 = vmatpush3.msra.mxu1 %v153_v10 }
  0x34   :  { %289 = vmatprep.subr.mxu1 %v388_v0 }
  0x35   :  { %290 = vmatpush3.msra.mxu1 %v152_v11 }
  0x36   :  { %291 = vmatprep.subr.mxu1 %v388_v0 }
  0x37   :  { %292 = vmatpush3.msra.mxu1 %v151_v12 }
  0x38   :  { %293 = vmatprep.subr.mxu1 %v388_v0 }
  0x39   :  { %294 = vmatpush3.msra.mxu1 %v150_v13 }
  0x3a   :  { %295 = vmatprep.subr.mxu1 %v388_v0 }
  0x3b   :  { %296 = vmatpush3.msra.mxu1 %v149_v14 }
  0x3c   :  { %297 = vmatprep.subr.mxu1 %v388_v0 }
  0x3d   :  { %298 = vmatpush3.msra.mxu1 %v148_v15 }
  0x3e   :  { %299 = vmatprep.subr.mxu1 %v388_v0 }
  0x3f   :  { %300 = vmatpush3.msra.mxu1 %v147_v16 }
  0x40   :  { %301 = vmatprep.subr.mxu1 %v388_v0 }
  0x41   :  { %302 = vmatpush3.msra.mxu1 %v146_v17 }
  0x42   :  { %303 = vmatprep.subr.mxu1 %v388_v0 }
  0x43   :  { %304 = vmatpush3.msra.mxu1 %v145_v18 }
  0x44   :  { %305 = vmatprep.subr.mxu1 %v388_v0 }
  0x45   :  { %306 = vmatpush3.msra.mxu1 %v144_v19 }
  0xea   :  { %v139_v21 = vpop.f32.mrf.mxu0 }
  0xeb   :  { %v140_v22 = vadd.f32 %v245_v20, %v139_v21 }
  0xec   :  { %v274_v23 = vpop.f32.mrf.mxu0 }
  0xed   :  { %v143_v24 = vmax.f32 %v140_v22, 0.0 }
  0xef   :  { %308 = vmatmul.mubr.f32.vlgmr.msra.gmra.mxu1 %v143_v24 }
 0x1af   :  { %v233_v26 = vpop.f32.mrf.mxu1 }
 0x1b0   :  { %v234_v27 = vadd.f32 %v247_v25, %v233_v26 }
 0x1b1   :  { %v309_v28 = vpop.f32.mrf.mxu1 }
 0x1b2   :  { %317 = vtanh.f32 %v234_v27 }
 0x1bf   :  { %v318_v29 = vpop.eup %317 }
 0x1c0   :  { %238 = vst [vmem:[%s443_s5] sm:$0xff] %v318_v29 }
 0x1c1   :  { %243 = vsyncpa [#allocation3], 1 }
 0x1c2   :  { %244 = vsyncpa [#allocation5], 1 }

</bundles_post_ra>
